<compile_context>
chip_gen: v6e
topology: v6e:2x2x1
jax: 0.10.0
libtpu: 0.0.40
codegen_flags: <defaults>
</compile_context>

<pallas_src>
import math

import jax
import jax.numpy as jnp
from jax.experimental import pallas as pl
from jax.experimental.pallas import tpu as pltpu


# VMEM budget the tile selector targets for double-buffered tiles + f32 acc.
# Sized against the tightest generation (v7x: 64 MiB physical, 32 MiB scoped
# default) so a single config is safe everywhere; vmem_limit_bytes is raised
# explicitly below to cover the chosen footprint.
_TILE_VMEM_BUDGET = 24 * 1024 * 1024
_VMEM_LIMIT_CAP = 48 * 1024 * 1024   # stay well under v7x's 64 MiB physical VMEM


def _chunk_fanout_kernel(x_ref, w_ref, b_ref, o_ref, acc_ref):
    """K-tiled body: f32 accumulator resident across the K grid axis.

    Bias is folded into the accumulator init (k == 0), so finalize is only a
    dtype cast/store — no extra (bm, bn) VPU add pass per output tile.
    """
    k = pl.program_id(2)

    @pl.when(k == 0)
    def _init():
        acc_ref[...] = jnp.broadcast_to(
            b_ref[...].astype(jnp.float32), acc_ref.shape)

    acc_ref[...] += jnp.dot(x_ref[...], w_ref[...],
                            preferred_element_type=jnp.float32)

    @pl.when(k == pl.num_programs(2) - 1)
    def _finalize():
        o_ref[...] = acc_ref[...].astype(o_ref.dtype)


def _chunk_fanout_kernel_single_k(x_ref, w_ref, b_ref, o_ref):
    """K fits one tile (bk == in_dim): no accumulator scratch needed at all."""
    o_ref[...] = (
        jnp.dot(x_ref[...], w_ref[...], preferred_element_type=jnp.float32)
        + b_ref[...].astype(jnp.float32)
    ).astype(o_ref.dtype)


def _aligned_divisors(total, align):
    """Divisors of `total` that are multiples of `align`, descending.

    Falls back to [total]: a full-extent block is always a legal block shape.
    """
    divs = [d for d in range(align, total + 1, align) if total % d == 0]
    return sorted(divs, reverse=True) if divs else [total]


def _tile_footprint(bm, bn, bk, xi, wi, bi, oi, with_acc):
    # 2x for pipeline double-buffering of the streamed x / W / bias / out tiles.
    buffered = 2 * (bm * bk * xi + bk * bn * wi + bn * bi + bm * bn * oi)
    return buffered + (bm * bn * 4 if with_acc else 0)


def chunk_fanout(x, w_cat_t, b_cat, *, bm=None, bn=None, bk=None):
    """y = x @ w_cat_t + b_cat  (fused ChunkFanOut forward).

    x:        (B, in_dim)
    w_cat_t:  (in_dim, out_dim)   concatenated per-chunk weights, transposed
    b_cat:    (out_dim,)          concatenated per-chunk biases
    """
    B, in_dim = x.shape
    k_dim, out_dim = w_cat_t.shape
    assert k_dim == in_dim
    assert b_cat.shape == (out_dim,)

    xi = jnp.dtype(x.dtype).itemsize
    wi = jnp.dtype(w_cat_t.dtype).itemsize
    bi = jnp.dtype(b_cat.dtype).itemsize
    oi = xi  # output dtype == x.dtype

    # ---- tile selection -----------------------------------------------------
    # Typical ChunkFanOut regime (small B, large out_dim) is W-bandwidth-bound:
    # pin bm = B, take bk = in_dim when it fits, and grow lane-dense bn to the
    # VMEM budget so every W byte is streamed from HBM exactly once.
    if bm is None:
        bm = B
        if B > 512:  # large-batch case: maximize bm so W is re-read only B/bm times
            for c in (512, 256, 128, 64, 32, 16, 8):
                if B % c == 0:
                    bm = c
                    break

    bn_cands = _aligned_divisors(out_dim, 128)   # lane-dense output tiles
    bk_cands = _aligned_divisors(in_dim, 128)

    if bk is None:
        bn_floor = bn_cands[-1]
        bk = bk_cands[-1]
        for cand in bk_cands:  # descending: prefer bk == in_dim (single K pass)
            if _tile_footprint(bm, bn_floor, cand, xi, wi, bi, oi,
                               with_acc=True) <= _TILE_VMEM_BUDGET:
                bk = cand
                break

    if bn is None:
        bn = bn_cands[-1]
        for cand in bn_cands:  # descending: largest lane-dense tile that fits
            if _tile_footprint(bm, cand, bk, xi, wi, bi, oi,
                               with_acc=True) <= _TILE_VMEM_BUDGET:
                bn = cand
                break
        # v7x has 2 TensorCores: keep >= 2 parallel (M x N) blocks when
        # possible so one core does not idle (no-op on single-core v5e/v6e).
        if (B // bm) * (out_dim // bn) == 1:
            for cand in bn_cands:
                if cand < bn:
                    bn = cand
                    break

    assert B % bm == 0, (B, bm)
    assert out_dim % bn == 0, (out_dim, bn)
    assert in_dim % bk == 0, (in_dim, bk)

    grid = (B // bm, out_dim // bn, in_dim // bk)
    single_k = grid[2] == 1

    b2d = b_cat.reshape(1, out_dim)

    # Advisory cost estimate; account for re-reads implied by the 3-D grid
    # (x is re-read once per N tile, W once per M tile).
    cost = pl.CostEstimate(
        flops=2 * B * in_dim * out_dim,
        transcendentals=0,
        bytes_accessed=(B * in_dim * grid[1] * xi
                        + in_dim * out_dim * grid[0] * wi
                        + out_dim * grid[0] * bi
                        + B * out_dim * oi),
    )

    footprint = _tile_footprint(bm, bn, bk, xi, wi, bi, oi, with_acc=not single_k)
    vmem_limit = int(min(max(footprint + (8 << 20), 16 << 20), _VMEM_LIMIT_CAP))

    kernel = _chunk_fanout_kernel_single_k if single_k else _chunk_fanout_kernel
    scratch = [] if single_k else [pltpu.VMEM((bm, bn), jnp.float32)]

    # TODO(synk): on v5e, optionally sweep pipeline_mode=pl.Buffered(3) on the
    # W BlockSpec and/or store w_cat_t in bf16 (f32 accumulate) to offset the
    # lower HBM bandwidth; both are caller-side accuracy/perf knobs.
    return pl.pallas_call(
        kernel,
        out_shape=jax.ShapeDtypeStruct((B, out_dim), x.dtype),
        grid_spec=pltpu.PrefetchScalarGridSpec(
            num_scalar_prefetch=0,
            grid=grid,
            in_specs=[
                pl.BlockSpec((bm, bk), lambda i, j, k: (i, k)),   # x
                pl.BlockSpec((bk, bn), lambda i, j, k: (k, j)),   # W (fused, transposed)
                pl.BlockSpec((1, bn), lambda i, j, k: (0, j)),    # bias
            ],
            out_specs=pl.BlockSpec((bm, bn), lambda i, j, k: (i, j)),
            scratch_shapes=scratch,
        ),
        compiler_params=pltpu.CompilerParams(
            dimension_semantics=("parallel", "parallel", "arbitrary"),
            vmem_limit_bytes=vmem_limit,
        ),
        cost_estimate=cost,
    )(x, w_cat_t, b2d)


def init_chunk_fanout_params(key, in_dim, out_dim, chunks, dtype=jnp.float32):
    """Deterministic init mirroring nn.Linear's default U(-1/sqrt(in), 1/sqrt(in)),
    one (out_dim//chunks, in_dim) weight + bias per chunk, concatenated."""
    assert out_dim % chunks == 0
    out_chunk = out_dim // chunks
    bound = 1.0 / math.sqrt(in_dim)
    ws, bs = [], []
    for _ in range(chunks):
        kw, kb, key = jax.random.split(key, 3)
        ws.append(jax.random.uniform(kw, (out_chunk, in_dim), dtype,
                                     minval=-bound, maxval=bound))
        bs.append(jax.random.uniform(kb, (out_chunk,), dtype,
                                     minval=-bound, maxval=bound))
    w_cat = jnp.concatenate(ws, axis=0)          # (out_dim, in_dim)  -- PyTorch layout
    b_cat = jnp.concatenate(bs, axis=0)          # (out_dim,)
    return w_cat.T, b_cat                        # kernel layout: (in_dim, out_dim)


if __name__ == "__main__":
    key = jax.random.PRNGKey(0)
    B, in_dim, out_dim, chunks = 16, 256, 256, 4

    kx, kp = jax.random.split(key)
    x = jax.random.normal(kx, (B, in_dim), jnp.float32)
    w_cat_t, b_cat = init_chunk_fanout_params(kp, in_dim, out_dim, chunks)

    # Explicit small tiles -> grid (2, 2, 2): exercises the multi-K kernel with
    # the bias-initialized f32 accumulator and both parallel axes.
    y = chunk_fanout(x, w_cat_t, b_cat, bm=8, bn=128, bk=128)
    jax.block_until_ready(y)

    # Auto-tiled path: bm=B, bk=in_dim (single K pass, no scratch), bn split so
    # there are >= 2 parallel output blocks for v7x's two TensorCores.
    y_auto = chunk_fanout(x, w_cat_t, b_cat)
    jax.block_until_ready(y_auto)

    # Reference: per-chunk Linear + concat (== fused affine map).
    out_chunk = out_dim // chunks
    parts = []
    for c in range(chunks):
        w_c = w_cat_t[:, c * out_chunk:(c + 1) * out_chunk]
        b_c = b_cat[c * out_chunk:(c + 1) * out_chunk]
        parts.append(jnp.dot(x, w_c, precision=jax.lax.Precision.HIGHEST) + b_c[None, :])
    y_ref = jnp.concatenate(parts, axis=1)

    assert y.shape == (B, out_dim)
    assert jnp.allclose(y, y_ref, atol=1e-3, rtol=1e-3)
    assert jnp.allclose(y_auto, y_ref, atol=1e-3, rtol=1e-3)

    print("KERNEL_OK")
</pallas_src>

<mosaic_0001>
module attributes {stable_mosaic.version = 11 : i64} {
  func.func @_chunk_fanout_kernel(%arg0: i32, %arg1: i32, %arg2: i32, %arg3: memref<8x128xf32, #tpu.memory_space<vmem>>, %arg4: memref<128x128xf32, #tpu.memory_space<vmem>>, %arg5: memref<1x128xf32, #tpu.memory_space<vmem>>, %arg6: memref<8x128xf32, #tpu.memory_space<vmem>>, %arg7: memref<8x128xf32, #tpu.memory_space<vmem>>) attributes {dimension_semantics = [#tpu.dimension_semantics<parallel>, #tpu.dimension_semantics<parallel>, #tpu.dimension_semantics<arbitrary>], iteration_bounds = array<i64: 2, 2, 2>, scalar_prefetch = 0 : i64, scratch_operands = 1 : i64, tpu.core_type = #tpu.core_type<tc>, window_params = [{transform_indices = @transform_0, window_bounds = array<i64: 8, 128>}, {transform_indices = @transform_1, window_bounds = array<i64: 128, 128>}, {transform_indices = @transform_2, window_bounds = array<i64: 1, 128>}, {transform_indices = @transform_3, window_bounds = array<i64: 8, 128>}]} {
    %c0_i32 = arith.constant 0 : i32
    %0 = arith.cmpi eq, %arg2, %c0_i32 : i32
    %1 = arith.extui %0 : i1 to i32
    %c0_i32_0 = arith.constant 0 : i32
    %2 = arith.cmpi ne, %1, %c0_i32_0 : i32
    scf.if %2 {
      %c0_9 = arith.constant 0 : index
      %c0_10 = arith.constant 0 : index
      %12 = vector.load %arg5[%c0_9, %c0_10] : memref<1x128xf32, #tpu.memory_space<vmem>>, vector<1x128xf32>
      %13 = vector.shape_cast %12 : vector<1x128xf32> to vector<1x128xf32>
      %14 = vector.broadcast %13 : vector<1x128xf32> to vector<8x128xf32>
      %c0_11 = arith.constant 0 : index
      %c0_12 = arith.constant 0 : index
      %15 = vector.load %arg7[%c0_11, %c0_12] : memref<8x128xf32, #tpu.memory_space<vmem>>, vector<8x128xf32>
      tpu.vector_store %arg7[%c0_11, %c0_12], %14 {strides = array<i32>} : memref<8x128xf32, #tpu.memory_space<vmem>>, vector<8x128xf32>,
    } else {
    }
    %c0 = arith.constant 0 : index
    %c0_1 = arith.constant 0 : index
    %3 = vector.load %arg7[%c0, %c0_1] : memref<8x128xf32, #tpu.memory_space<vmem>>, vector<8x128xf32>
    %c0_2 = arith.constant 0 : index
    %c0_3 = arith.constant 0 : index
    %4 = vector.load %arg3[%c0_2, %c0_3] : memref<8x128xf32, #tpu.memory_space<vmem>>, vector<8x128xf32>
    %c0_4 = arith.constant 0 : index
    %c0_5 = arith.constant 0 : index
    %5 = vector.load %arg4[%c0_4, %c0_5] : memref<128x128xf32, #tpu.memory_space<vmem>>, vector<128x128xf32>
    %cst = arith.constant dense<0.000000e+00> : vector<8x128xf32>
    %6 = tpu.matmul %4, %5, %cst {dimension_numbers = #tpu.dot_dimension_numbers<[1], [0], [0], [1], [0, 0, 1, 1], [], []>} : vector<8x128xf32>, vector<128x128xf32>, vector<8x128xf32> -> vector<8x128xf32>
    %7 = arith.addf %3, %6 : vector<8x128xf32>
    %c0_6 = arith.constant 0 : index
    %c0_7 = arith.constant 0 : index
    %8 = vector.load %arg7[%c0_6, %c0_7] : memref<8x128xf32, #tpu.memory_space<vmem>>, vector<8x128xf32>
    tpu.vector_store %arg7[%c0_6, %c0_7], %7 {strides = array<i32>} : memref<8x128xf32, #tpu.memory_space<vmem>>, vector<8x128xf32>,
    %c1_i32 = arith.constant 1 : i32
    %9 = arith.cmpi eq, %arg2, %c1_i32 : i32
    %10 = arith.extui %9 : i1 to i32
    %c0_i32_8 = arith.constant 0 : i32
    %11 = arith.cmpi ne, %10, %c0_i32_8 : i32
    scf.if %11 {
      %c0_9 = arith.constant 0 : index
      %c0_10 = arith.constant 0 : index
      %12 = vector.load %arg7[%c0_9, %c0_10] : memref<8x128xf32, #tpu.memory_space<vmem>>, vector<8x128xf32>
      %c0_11 = arith.constant 0 : index
      %c0_12 = arith.constant 0 : index
      %13 = vector.load %arg6[%c0_11, %c0_12] : memref<8x128xf32, #tpu.memory_space<vmem>>, vector<8x128xf32>
      tpu.vector_store %arg6[%c0_11, %c0_12], %12 {strides = array<i32>} : memref<8x128xf32, #tpu.memory_space<vmem>>, vector<8x128xf32>,
    } else {
    }
    return
  }
  func.func @transform_0(%arg0: i32, %arg1: i32, %arg2: i32) -> (i32, i32) {
    %c0_i32 = arith.constant 0 : i32
    return %arg0, %arg2 : i32, i32
  }
  func.func @transform_1(%arg0: i32, %arg1: i32, %arg2: i32) -> (i32, i32) {
    %c0_i32 = arith.constant 0 : i32
    return %arg2, %arg1 : i32, i32
  }
  func.func @transform_2(%arg0: i32, %arg1: i32, %arg2: i32) -> (i32, i32) {
    %c0_i32 = arith.constant 0 : i32
    %c0_i32_0 = arith.constant 0 : i32
    return %c0_i32, %arg1 : i32, i32
  }
  func.func @transform_3(%arg0: i32, %arg1: i32, %arg2: i32) -> (i32, i32) {
    %c0_i32 = arith.constant 0 : i32
    return %arg0, %arg1 : i32, i32
  }
}

</mosaic_0001>

<bundles_post_ra>
// kernel: tpu_custom_call.1
= control target key start
LH: loop header
LB: loop body
LE: loop exit
PB: predicated region body
PF: predicated region fallthrough
CT: control target
= control target key end

     0   :  { %s1336_s0 = inlined_call_operand.hbm [shape: f32[16,256], index: 0, kind: input, shape index: {}]   ;;  %s1337_s1 = inlined_call_operand.hbm [shape: f32[256,256], index: 1, kind: input, shape index: {}]   ;;  %s1338_s2 = inlined_call_operand.vmem [shape: f32[1,256], index: 2, kind: input, shape index: {}]   ;;  %s1339_s3 = inlined_call_operand.hbm [shape: f32[16,256], index: 3, kind: output, shape index: {}]  }
   0x1   :  { %1353 = sst [smem:[#allocation23_spill]] %s1336_s0 }
   0x2   :  { %1354 = sst [smem:[#allocation24_spill]] %s1339_s3 }
   0x3   :  { %8 = vsyncpa [#allocation4], 0 }
   0x4   :  { %10 = vsyncpa [#allocation4 + $0x1], 0 }
   0x5   :  { %11 = vsyncpa [#allocation7], 0 }
   0x6   :  { %13 = vsyncpa [#allocation7 + $0x1], 0 }
   0x7   :  { %14 = vsyncpa [#allocation5], 0 }
   0x8   :  { %16 = vsyncpa [#allocation5 + $0x1], 0  ;;  %s997_s12 = smov 0   ;;  %s999_s13 = smov 0  }
   0x9   :  { %s1001_s14 = smov 0   ;;  %s1003_s15 = smov 0  }
   0xa   :  { %s1005_s16 = smov 0   ;;  %s1007_s17 = smov 0  }
   0xb   :  { %s1009_s18 = smov 0   ;;  %s1011_s19 = smov 0  }
   0xc   :  { %s1013_s20 = smov 0   ;;  %s1015_s21 = smov 0  }
   0xd   :  { %s1017_s22 = smov 0   ;;  %s1019_s23 = smov 0  }
   0xe   :  { %s1021_s24 = smov 0   ;;  %s1023_s25 = smov 0  }
   0xf   :  { %s1025_s26 = smov 0   ;;  %s1027_s27 = smov 0  }
  0x10 LB: > { %1355 = sst [smem:[#allocation12_spill]] %s907_s12  ;;  %s1340_s28 = sadd.s32 4294967295, %s967_s27   ;;  %s967_s27 = sphi %s1027_s27, %s22_s27   ;;  %s963_s26 = sphi %s1025_s26, %s1395_s26   ;;  %s959_s25 = sphi %s1023_s25, %s1406_s25   ;;  %s955_s24 = sphi %s1021_s24, %s1405_s24   ;;  %s951_s23 = sphi %s1019_s23, %s1392_s23   ;;  %s947_s22 = sphi %s1017_s22, %s1404_s22   ;;  %s943_s21 = sphi %s1015_s21, %s1403_s21   ;;  %s939_s20 = sphi %s1013_s20, %s1391_s20   ;;  %s935_s19 = sphi %s1011_s19, %s1402_s19   ;;  %s931_s18 = sphi %s1009_s18, %s1401_s18   ;;  %s927_s17 = sphi %s1007_s17, %s1400_s17   ;;  %s923_s16 = sphi %s1005_s16, %s1399_s16   ;;  %s919_s15 = sphi %s1003_s15, %s1398_s15   ;;  %s915_s14 = sphi %s1001_s14, %s1388_s14   ;;  %s911_s13 = sphi %s999_s13, %s1397_s13   ;;  %s907_s12 = sphi %s997_s12, %s1396_s12  }
  0x11   : > { %1356 = sst [smem:[#allocation13_spill]] %s915_s14  ;;  %s34_s30 = sadd.s32 1, %s955_s24 }
  0x12   : > { %1357 = sst [smem:[#allocation14_spill]] %s939_s20  ;;  %s37_s4 = sadd.s32 1, %s959_s25 }
  0x13   : > { %1358 = sst [smem:[#allocation15_spill]] %s963_s26  ;;  %p35_p0 = scmp.ge.s32.totalorder %s34_s30, 2 }
  0x14   : > { %s41_s5 = sadd.s32 1, %s963_s26  ;;  %s50_s6 = sadd.s32 1, %s939_s20 }
  0x15   : > { %p57_p1 = scmp.ne.s32.totalorder %s939_s20, %s935_s19  ;;  %s1408_s30 = smov (%p35_p0, %s34_s30), 0 }
  0x16   : > { %1359 = sst [smem:[#allocation16_spill]] %s1408_s30  ;;  %s1410_s4 = smov (!%p35_p0, %s37_s4), %s959_s25 }
  0x17   : > { %s46_s7 = ssub.s32 %s955_s24, %s1408_s30  ;;  %p58_p2 = scmp.eq.s32.totalorder %s967_s27, 0 }
  0x18   : > { %p39_p3 = scmp.ge.s32.totalorder %s1410_s4, 2  ;;  %p63_p4 = scmp.ne.s32.totalorder %s935_s19, %s931_s18 }
  0x19   : > { %p1092_p5 = por %p58_p2, %p57_p1  ;;  %p1098_p6 = scmp.eq.s32.totalorder %s1340_s28, 0 }
  0x1a   : > { %s1412_s4 = smov (%p39_p3, %s1410_s4), 0  ;;  %s1414_s5 = smov (!%p39_p3, %s41_s5), %s963_s26 }
  0x1b   : > { %1362 = sst [smem:[#allocation17_spill]] %s1412_s4  ;;  %p1107_p7 = por %p1098_p6, %p63_p4 }
  0x1c   : > { %s74_s11 = ssub.s32 %s959_s25, %s1412_s4  ;;  %p43_p8 = scmp.ge.s32.totalorder %s1414_s5, 2 }
  0x1d   : > { %s75_s18 = sor.u32 %s74_s11, %s46_s7  ;;  %s78_s29 = sadd.s32 1, %s927_s17 }
  0x1e   : > { %p76_p9 = scmp.eq.s32.totalorder %s75_s18, 0  ;;  %s1416_s5 = smov (%p43_p8, %s1414_s5), 0 }
  0x1f   : > { %1364 = sst [smem:[#allocation18_spill]] %s1416_s5  ;;  %s45_s30 = ssub.s32 %s963_s26, %s1416_s5 }
  0x20   : > { %s1117_s28 = scalar_select %p76_p9, %s927_s17, %s78_s29  }
  0x21   : > { %p85_p10 = scmp.ne.s32.totalorder %s927_s17, %s923_s16  ;;  %s47_s4 = sor.u32 %s46_s7, %s45_s30 }
  0x22   : > { %1365 = sst [smem:[#allocation19_spill]] %s1117_s28  ;;  %p91_p11 = scmp.ne.s32.totalorder %s923_s16, %s919_s15 }
  0x23   : > { %p48_p12 = scmp.eq.s32.totalorder %s47_s4, 0  ;;  %p1127_p13 = por %p85_p10, %p58_p2 }
  0x24   : > { %p1133_p0 = por %p91_p11, %p1098_p6  ;;  %s129_s5 = sor.u32 %s74_s11, %s45_s30 }
  0x25   : > { %s1138_s28 = scalar_select %p48_p12, %s939_s20, %s50_s6  }
  0x26   : > { %s1367_s29 = scalar_select %p1133_p0, 1, 0 }
  0x27   : > { %1368 = sst [smem:[#allocation20_spill]] %s1138_s28  ;;  %p130_p1 = scmp.eq.s32.totalorder %s129_s5, 0 }
  0x28   : > { %s132_s7 = sadd.s32 1, %s915_s14  ;;  %p142_p3 = scmp.ne.s32.totalorder %s915_s14, %s911_s13 }
  0x29   : > { %s1369_s15 = sadd.s32 4294967295, %s967_s27   ;;  %p148_p6 = scmp.ne.s32.totalorder %s911_s13, %s907_s12 }
  0x2a   : > { %p143_p4 = scmp.eq.s32.totalorder %s1369_s15, 7  ;;  %s1373_s30 = sadd.s32 4294967294, %s967_s27  }
  0x2b   : > { %s1146_s4 = scalar_select %p130_p1, %s915_s14, %s132_s7  }
  0x2c   : > { %p1148_p2 = por %p143_p4, %p142_p3  ;;  %p149_p8 = scmp.eq.s32.totalorder %s1373_s30, 7 }
  0x2d   : > { %1370 = sst [smem:[#allocation21_spill]] %s1146_s4  ;;  %p612_p9 = scmp.lt.s32.totalorder %s967_s27, 8 }
  0x2e   : > { %s1371_s9 = scalar_select %p1148_p2, 1, 0 }
  0x2f   : > { %s169_s5 = sand.u32 1, %s939_s20   ;;  %p1158_p10 = por %p149_p8, %p148_p6 }
  0x30   : > { %1372 = sst [smem:[#allocation22_spill]] %s1371_s9  ;;  %s523_s11 = sshll.u32 %s169_s5, 3 }
  0x31   : > { %s1374_s6 = scalar_select %p1158_p10, 1, 0 }
  0x32   : > { %s524_s7 = sshll.u32 %s963_s26, 1  ;;  %s173_s4 = scalar_lea.vmem [#allocation3], %s523_s11 }
  0x33   : > { %s178_s15 = sadd.s32 %s955_s24, %s524_s7  ;;  %s182_s14 = sshll.u32 %s173_s4, 4  ;;  %s183_s14 = int_to_ptr.vmem [resolvable:$true] %s182_s14 }
  0x34   : > { %s525_s28 = sshll.u32 %s178_s15, 7  ;;  %s1375_s0 = sld [smem:[#allocation23_spill]] }
  0x35   : > { %p1171_p11 = pnand %p612_p9, %p1092_p5  ;;  %s542_s20 = sshll.u32 %s955_s24, 5 }
  0x36   : > { %p1180_p12 = pnand %p612_p9, %p1127_p13  ;;  %p530_p1 = scmp.ge.s32.totalorder %s967_s27, 1 }
  0x37   : > { %p216_p3 = scmp.lt.s32.totalorder %s967_s27, 9  ;;  %s170_s4 = scalar_lea.sflag [#allocation4], %s169_s5 }
  0x38   : > { %p749_p4 = pneg %p1171_p11  ;;  %s760_s3 = scalar_lea.vmem %s183_s14, 128 }
  0x39   : > { %p761_p6 = scmp.ne.s32.totalorder %s183_s14, %s760_s3 }
  0x3a   : > { %s180_s12 = scalar_lea.hbm %s1375_s0, %s525_s28  ;;  %s969_s28 = smov [#allocation3]  }
  0x3b   : > { %p763_p8 = pnand %p761_p6, %p749_p4  ;;  %s765_s8 = sshll.u32 %s969_s28, 4  ;;  %s766_s8 = int_to_ptr.vmem [resolvable:$false] %s765_s8 }
  0x3c   : > { %s767_s9 = scalar_lea.vmem %s766_s8, 256  ;;  %p768_p10 = scmp.lt.s32.totalorder %s183_s14, %s766_s8 }
  0x3d   : > { %p764_p5 = pneg %p763_p8  ;;  %p769_p2 = scmp.lt.s32.totalorder %s767_s9, %s760_s3 }
  0x3f   : > { %p770_p0 = por %p769_p2, %p768_p10 }
  0x41   : > { %p771_p13 = pnand %p770_p0, %p764_p5 }
  0x43   : > { %774 = shalt.err (!%p771_p13)
}
  0x44   : > { %604 = dma.hbm_to_vmem [thread:$0]  (!%p1171_p11), %s180_s12, 128, %s183_s14, %s170_s4  }
  0x45   : > { %p1194_p9 = pnand %p530_p1, %p216_p3  ;;  %s189_s5 = sand.u32 1, %s927_s17  }
  0x46   : > { %s199_s11 = sadd.s32 %s959_s25, %s542_s20  ;;  %s526_s15 = sshll.u32 %s189_s5, 7 }
  0x47   : > { %s529_s3 = sshll.u32 %s199_s11, 7  ;;  %s193_s9 = scalar_lea.vmem [#allocation6], %s526_s15 }
  0x48   : > { %s201_s30 = scalar_lea.hbm %s1337_s1, %s529_s3  ;;  %s202_s0 = sshll.u32 %s193_s9, 4  ;;  %s203_s0 = int_to_ptr.vmem [resolvable:$true] %s202_s0 }
  0x49   : > { %s190_s26 = scalar_lea.sflag [#allocation7], %s189_s5  ;;  %p777_p0 = pneg %p1180_p12 }
  0x4a   : > { %s788_s12 = scalar_lea.vmem %s203_s0, 2048  ;;  %s970_s14 = smov [#allocation6]  }
  0x4b   : > { %p789_p2 = scmp.ne.s32.totalorder %s203_s0, %s788_s12  ;;  %s793_s4 = sshll.u32 %s970_s14, 4  ;;  %s794_s4 = int_to_ptr.vmem [resolvable:$false] %s793_s4 }
  0x4c   : > { %s795_s20 = scalar_lea.vmem %s794_s4, 4096  ;;  %p796_p1 = scmp.lt.s32.totalorder %s203_s0, %s794_s4 }
  0x4d   : > { %p791_p10 = pnand %p789_p2, %p777_p0  ;;  %p797_p3 = scmp.lt.s32.totalorder %s795_s20, %s788_s12 }
  0x4f   : > { %p792_p11 = pneg %p791_p10  ;;  %p798_p4 = por %p797_p3, %p796_p1 }
  0x51   : > { %p799_p6 = pnand %p798_p4, %p792_p11 }
  0x53   : > { %802 = shalt.err (!%p799_p6)
}
  0x54   : > { %s971_s11 = smov 256   ;;  %s972_s15 = smov 128  }
  0x55   : > { %s973_s3 = smov 8   ;;  %220 = sbr.rel (%p1194_p9) target bundleno = 369 (0x171), region = 32 }
  0x56   : > { %607 = dma.hbm_to_vmem [thread:$0]  (!%p1180_p12), %s201_s30, 2048, %s203_s0, %s190_s26, %s971_s11, %s972_s15, %s973_s3  }
  0x57   : > { %s222_s5 = sand.u32 (!%p1194_p9), 1, %s935_s19  }
  0x58   : > { %s1210_s28 = sshll.u32 (!%p1194_p9), %s222_s5, 3  ;;  %s223_s8 = scalar_lea.sflag (!%p1194_p9), [#allocation4], %s222_s5 }
  0x59   : > { %s226_s9 = scalar_lea.vmem (!%p1194_p9), [#allocation3], %s1210_s28 }
  0x5a   : > { %894 = dma.done.wait (%p1107_p7), %s223_s8, 128  }
  0x5b   : > { %896 = vsyncadd (%p1107_p7), %s223_s8, 4294967168  ;;  %s231_s7 = sand.u32 1, %s923_s16   ;;  %p1379_p12 = scmp.ne.s32.totalorder %s1367_s29, 0 }
  0x5c   : > { %s532_s0 = sshll.u32 %s231_s7, 7  ;;  %s232_s26 = scalar_lea.sflag [#allocation7], %s231_s7 }
  0x5d   : > { %s1218_s18 = scalar_lea.vmem [#allocation6], %s532_s0 }
  0x5e   : > { %898 = dma.done.wait (%p1379_p12), %s232_s26, 2048  }
  0x5f   : > { %900 = vsyncadd (%p1379_p12), %s232_s26, 4294965248  ;;  %s263_s30 = sand.u32 1, %s911_s13   ;;  %p267_p8 = scmp.lt.s32.totalorder %s947_s22, 1 }
  0x60   : > { %s1228_s10 = sshll.u32 %s263_s30, 3  ;;  %p534_p7 = scmp.ne.s32.totalorder %s943_s21, 0 }
  0x61   : > { %s268_s12 = scalar_select %p267_p8, %s947_s22, 1 }
  0x62   : > { %s265_s11 = scalar_lea.vmem [#allocation8], %s1228_s10  ;;  %273 = sbr.rel (%p534_p7) target bundleno = 105 (0x69), region = 44 }
  0x63   : > { %s269_s20 = scalar_lea.vmem %s1338_s2, %s268_s12 }
  0x67   : > { %v535_v0 = vld [vmem:[%s269_s20] ss:$0 sm:$0xff] }
  0x68   : > { %281 = vst [vmem:[#allocation2] sm:$0xff] %v535_v0 }
  0x69 PF: > { %v299_v1 = vld [vmem:[%s1218_s18 + $0x78] sm:$0xff]  ;;  %v974_v2 = vmov 0.0   ;;  %v298_v3 = vld [vmem:[%s1218_s18 + $0x70] sm:$0xff]  ;;  %vm975_vm0 = vmmov 0   ;;  %v297_v4 = vld [vmem:[%s1218_s18 + $0x68] sm:$0xff]  ;;  %p536_p5 = scmp.ne.s32.totalorder %s943_s21, 1 }
  0x6a   : > { %560 = vmatprep.subr.mxu0 %v974_v2  ;;  %592 = vmatprep.mubr.msk.f32.mxu0 %vm975_vm0, %v974_v2  ;;  %v296_v5 = vld [vmem:[%s1218_s18 + $0x60] sm:$0xff]  ;;  %v295_v6 = vld [vmem:[%s1218_s18 + $0x58] sm:$0xff]  ;;  %v294_v7 = vld [vmem:[%s1218_s18 + $0x50] sm:$0xff] }
  0x6b   : > { %561 = vmatpush3.msra.mxu0 %v299_v1  ;;  %v293_v8 = vld [vmem:[%s1218_s18 + $0x48] sm:$0xff]  ;;  %v292_v9 = vld [vmem:[%s1218_s18 + $0x40] sm:$0xff]  ;;  %v291_v10 = vld [vmem:[%s1218_s18 + $0x38] sm:$0xff] }
  0x6c   : > { %562 = vmatprep.subr.mxu0 %v974_v2  ;;  %v290_v11 = vld [vmem:[%s1218_s18 + $0x30] sm:$0xff]  ;;  %v289_v12 = vld [vmem:[%s1218_s18 + $0x28] sm:$0xff]  ;;  %v288_v13 = vld [vmem:[%s1218_s18 + $0x20] sm:$0xff] }
  0x6d   : > { %563 = vmatpush3.msra.mxu0 %v298_v3  ;;  %v287_v14 = vld [vmem:[%s1218_s18 + $0x18] sm:$0xff]  ;;  %v286_v15 = vld [vmem:[%s1218_s18 + $0x10] sm:$0xff]  ;;  %v285_v16 = vld [vmem:[%s1218_s18 + $0x8] sm:$0xff] }
  0x6e   : > { %564 = vmatprep.subr.mxu0 %v974_v2  ;;  %v284_v17 = vld [vmem:[%s1218_s18] sm:$0xff]  ;;  %v283_v18 = vld [vmem:[%s226_s9] sm:$0xff] }
  0x6f   : > { %565 = vmatpush3.msra.mxu0 %v297_v4  ;;  %v282_v19 = vld [vmem:[#allocation2] sm:$0xff] }
  0x70   : > { %566 = vmatprep.subr.mxu0 %v974_v2 }
  0x71   : > { %567 = vmatpush3.msra.mxu0 %v296_v5 }
  0x72   : > { %568 = vmatprep.subr.mxu0 %v974_v2 }
  0x73   : > { %569 = vmatpush3.msra.mxu0 %v295_v6 }
  0x74   : > { %570 = vmatprep.subr.mxu0 %v974_v2 }
  0x75   : > { %571 = vmatpush3.msra.mxu0 %v294_v7 }
  0x76   : > { %572 = vmatprep.subr.mxu0 %v974_v2 }
  0x77   : > { %573 = vmatpush3.msra.mxu0 %v293_v8 }
  0x78   : > { %574 = vmatprep.subr.mxu0 %v974_v2 }
  0x79   : > { %575 = vmatpush3.msra.mxu0 %v292_v9 }
  0x7a   : > { %576 = vmatprep.subr.mxu0 %v974_v2 }
  0x7b   : > { %577 = vmatpush3.msra.mxu0 %v291_v10 }
  0x7c   : > { %578 = vmatprep.subr.mxu0 %v974_v2 }
  0x7d   : > { %579 = vmatpush3.msra.mxu0 %v290_v11 }
  0x7e   : > { %580 = vmatprep.subr.mxu0 %v974_v2 }
  0x7f   : > { %581 = vmatpush3.msra.mxu0 %v289_v12 }
  0x80   : > { %582 = vmatprep.subr.mxu0 %v974_v2 }
  0x81   : > { %583 = vmatpush3.msra.mxu0 %v288_v13 }
  0x82   : > { %584 = vmatprep.subr.mxu0 %v974_v2 }
  0x83   : > { %585 = vmatpush3.msra.mxu0 %v287_v14 }
  0x84   : > { %586 = vmatprep.subr.mxu0 %v974_v2 }
  0x85   : > { %587 = vmatpush3.msra.mxu0 %v286_v15 }
  0x86   : > { %588 = vmatprep.subr.mxu0 %v974_v2 }
  0x87   : > { %589 = vmatpush3.msra.mxu0 %v285_v16 }
  0x88   : > { %590 = vmatprep.subr.mxu0 %v974_v2 }
  0x89   : > { %591 = vmatpush3.msra.mxu0 %v284_v17 }
  0x8a   : > { %593 = vmatmul.mubr.f32.vlgmr.msra.gmra.mxu0 %v283_v18 }
 0x149   : > { %375 = sbr.rel (%p536_p5) target bundleno = 342 (0x156), region = 48 }
 0x14a   : > { %v366_v20 = vpop.f32.mrf.mxu0 }
 0x14b   : > { %v370_v21 = vadd.f32 %v366_v20, %v282_v19 }
 0x14c   : > { %v594_v22 = vpop.f32.mrf.mxu0 }
 0x14d   : > { %371 = vst [vmem:[#allocation2] sm:$0xff] %v370_v21 }
 0x154   : > { %v376_v23 = vld [vmem:[#allocation2] sm:$0xff] }
 0x155   : > { %377 = vst [vmem:[%s265_s11] sm:$0xff] %v376_v23 }
 0x156 PF: > { %s1380_s29 = sld [smem:[#allocation22_spill]]  ;;  %s538_s15 = sshll.u32 %s951_s23, 1 }
 0x157   : > { %s390_s3 = sadd.s32 %s947_s22, %s538_s15  ;;  %s394_s5 = sshll.u32 %s265_s11, 4  ;;  %s395_s5 = int_to_ptr.vmem [resolvable:$true] %s394_s5 }
 0x158   : > { %s539_s28 = sshll.u32 %s390_s3, 7  ;;  %s1381_s21 = sld [smem:[#allocation24_spill]] }
 0x159   : > { %s379_s26 = scalar_lea.sflag [#allocation5], %s263_s30  ;;  %s803_s18 = scalar_lea.vmem %s395_s5, 128 }
 0x15a   : > { %p804_p13 = scmp.ne.s32.totalorder %s395_s5, %s803_s18  ;;  %s976_s12 = smov [#allocation8]  }
 0x15b   : > { %s807_s14 = sshll.u32 %s976_s12, 4  ;;  %s808_s14 = int_to_ptr.vmem [resolvable:$false] %s807_s14 }
 0x15c   : > { %p1383_p9 = scmp.ne.s32.totalorder %s1380_s29, 0  ;;  %s809_s23 = scalar_lea.vmem %s808_s14, 256 }
 0x15d   : > { %p810_p10 = scmp.lt.s32.totalorder %s395_s5, %s808_s14  ;;  %p811_p11 = scmp.lt.s32.totalorder %s809_s23, %s803_s18 }
 0x15e   : > { %s1382_s7 = smov %s1381_s21  ;;  %s392_s0 = scalar_lea.hbm %s1381_s21, %s539_s28 }
 0x15f   : > { %p805_p0 = pnand %p804_p13, %p1383_p9  ;;  %p812_p1 = por %p811_p11, %p810_p10 }
 0x161   : > { %p806_p2 = pneg %p805_p0 }
 0x163   : > { %p813_p3 = pnand %p812_p1, %p806_p2 }
 0x165   : > { %816 = shalt.err (!%p813_p3)
}
 0x166   : > { %s817_s22 = scalar_lea.hbm %s392_s0, 128  ;;  %s821_s4 = scalar_lea.hbm %s1382_s7, 512 }
 0x167   : > { %p818_p4 = scmp.ne.s32.totalorder %s392_s0, %s817_s22  ;;  %p822_p8 = scmp.lt.s32.totalorder %s392_s0, %s1382_s7 }
 0x168   : > { %p823_p7 = scmp.lt.s32.totalorder %s821_s4, %s817_s22 }
 0x169   : > { %p819_p6 = pnand %p818_p4, %p1383_p9 }
 0x16a   : > { %p824_p5 = por %p823_p7, %p822_p8 }
 0x16b   : > { %p820_p12 = pneg %p819_p6 }
 0x16d   : > { %p825_p13 = pnand %p824_p5, %p820_p12 }
 0x16f   : > { %828 = shalt.err (!%p825_p13)
}
 0x170   : > { %599 = dma.vmem_to_hbm [thread:$0]  (%p1383_p9), %s395_s5, 128, %s392_s0, %s379_s26  }
 0x171 PF: > { %s1384_s15 = sld [smem:[#allocation12_spill]]  ;;  %p613_p0 = scmp.ge.s32.totalorder %s967_s27, 2 }
 0x172   : > { %p1385_p2 = scmp.ne.s32.totalorder %s1374_s6, 0 }
 0x174   : > { %p609_p10 = pnand %p613_p0, %p1385_p2 }
 0x176   : > { %p610_p11 = pneg %p609_p10 }
 0x177   : > { %s406_s3 = sand.u32 1, %s1384_s15  }
 0x178   : > { %s407_s28 = scalar_lea.sflag [#allocation5], %s406_s3 }
 0x179   : > { %902 = dma.done.wait (%p610_p11), %s407_s28, 128  }
 0x17a   : > { %904 = vsyncadd (%p610_p11), %s407_s28, 4294967168  ;;  %s22_s27 = sadd.s32 1, %s967_s27   ;;  %s1387_s29 = sld [smem:[#allocation13_spill]] }
 0x17b   : > { %p1283_p1 = scmp.ge.s32.totalorder %s22_s27, 10   ;;  %s1388_s14 = sld [smem:[#allocation21_spill]] }
 0x17c   : > { %s1389_s5 = sld [smem:[#allocation19_spill]]  ;;  %s1396_s12 = smov %s911_s13 }
 0x17d   : > { %s1390_s9 = sld [smem:[#allocation14_spill]]  ;;  %s1398_s15 = smov %s923_s16 }
 0x17e   : > { %s1391_s20 = sld [smem:[#allocation20_spill]]  ;;  %s1399_s16 = smov %s927_s17 }
 0x17f   : > { %s1392_s23 = sld [smem:[#allocation15_spill]]  ;;  %s1401_s18 = smov %s935_s19 }
 0x180   : > { %s1393_s6 = sld [smem:[#allocation16_spill]]  ;;  %s1397_s13 = smov %s1387_s29 }
 0x181   : > { %s1394_s0 = sld [smem:[#allocation17_spill]]  ;;  %s1403_s21 = smov %s955_s24 }
 0x182   : > { %s1395_s26 = sld [smem:[#allocation18_spill]]  ;;  %s1400_s17 = smov %s1389_s5 }
 0x183   : > { %s1402_s19 = smov %s1390_s9  ;;  %s1404_s22 = smov %s959_s25 }
 0x184   :  { %21 = sbr.rel (!%p1283_p1) target bundleno = 16 (0x10), region = 101 }
 0x186   : > { %s1405_s24 = smov %s1393_s6 }
 0x187   : > { %s1406_s25 = smov %s1394_s0 }
 0x189   :  { %412 = vsyncpa [#allocation4], 1 }
 0x18a   :  { %414 = vsyncpa [#allocation4 + $0x1], 1 }
 0x18b   :  { %415 = vsyncpa [#allocation7], 1 }
 0x18c   :  { %417 = vsyncpa [#allocation7 + $0x1], 1 }
 0x18d   :  { %418 = vsyncpa [#allocation5], 1 }
 0x18e   :  { %420 = vsyncpa [#allocation5 + $0x1], 1 }

</bundles_post_ra>
